<compile_context>
chip_gen: v7x
topology: tpu7x:2x2x1
jax: 0.10.0
libtpu: 0.0.40
codegen_flags: <defaults>
</compile_context>

<pallas_src>
import functools

import jax
import jax.numpy as jnp
from jax import lax
from jax.experimental import pallas as pl
from jax.experimental.pallas import tpu as pltpu

# ---- layout constants ------------------------------------------------------
_NUM_CLASSES = 2
_IN_PAD = 16            # input features 10 -> 16 sublanes; row 15 is the constant 1
_ONE_ROW = _IN_PAD - 1
_HID_PAD = 32           # hidden width 20 -> 32 sublanes; row 31 carries the 1 forward
_CARRY_ROW = _HID_PAD - 1
_OUT_PAD = 8            # logits 2 -> 8 sublanes (compact output)
_SLAB_LANES = 32        # packed-weight lane width

# Row offsets of each weight block inside the packed (104, 32) parameter slab.
_W0 = 0                 # (32, 16): valid (20, 10), col 15 = b0, [31, 15] = 1
_W1 = 32                # (32, 32): valid (20, 20), col 31 = b1, [31, 31] = 1
_W2 = 64                # (32, 32): valid (20, 20), col 31 = b2, [31, 31] = 1
_W3 = 96                # (8, 32):  valid (2, 20),  col 31 = b3
_PACK_ROWS = _W3 + _OUT_PAD   # 104


def _round_up(n, m):
    return (n + m - 1) // m * m


# ---- kernel ----------------------------------------------------------------
def mlp_kernel(x_ref, p_ref, o_ref):
    """One batch tile (batch on lanes) of the fully fused MLP forward."""
    dot = functools.partial(jnp.dot, preferred_element_type=jnp.float32,
                            precision=lax.Precision.HIGHEST)

    x = x_ref[...]                                        # (16, TB); row 15 == 1

    # Layer 0: (32,16)@(16,TB). Biases ride in column _ONE_ROW; hidden row 31
    # becomes the constant 1 that feeds the next layer's bias column.
    h = jnp.maximum(dot(p_ref[_W0:_W0 + _HID_PAD, :_IN_PAD], x), 0.0)
    # Layers 1-2: (32,32)@(32,TB); padded rows stay exactly zero, row 31 stays 1.
    h = jnp.maximum(dot(p_ref[_W1:_W1 + _HID_PAD, :], h), 0.0)
    h = jnp.maximum(dot(p_ref[_W2:_W2 + _HID_PAD, :], h), 0.0)
    # Layer 3: (8,32)@(32,TB) -> logits on sublanes 0..1, rows 2..7 are zero.
    logits = dot(p_ref[_W3:_W3 + _OUT_PAD, :], h)

    # Mask padded class rows (-1e30, not -inf, to avoid inf-inf NaNs), then a
    # numerically stable log-softmax over the (8-sublane) class axis.
    row = lax.broadcasted_iota(jnp.int32, logits.shape, 0)
    logits = jnp.where(row < _NUM_CLASSES, logits, jnp.float32(-1e30))
    m = jnp.max(logits, axis=0, keepdims=True)
    shifted = logits - m
    lse = jnp.log(jnp.sum(jnp.exp(shifted), axis=0, keepdims=True))
    o_ref[...] = shifted - lse                            # lane-dense (8, TB) store


# ---- parameter packing ------------------------------------------------------
def pack_params(params):
    """params: [(W (out,in), b (out,)) x4] torch layout -> one (104, 32) f32 slab.

    Biases are folded into an extra "input" column: the wrapper feeds a constant-1
    row at x row _ONE_ROW; each weight block puts its bias in that column and
    propagates the 1 to the next layer via a single 1.0 at [_CARRY_ROW, col].
    """
    (w0, b0), (w1, b1), (w2, b2), (w3, b3) = [
        (jnp.asarray(w, jnp.float32), jnp.asarray(b, jnp.float32)) for w, b in params
    ]
    slab = jnp.zeros((_PACK_ROWS, _SLAB_LANES), jnp.float32)

    # layer 0: bias in column _ONE_ROW (=15) of the 16-wide input block.
    slab = slab.at[_W0:_W0 + w0.shape[0], :w0.shape[1]].set(w0)
    slab = slab.at[_W0:_W0 + b0.shape[0], _ONE_ROW].set(b0)
    slab = slab.at[_W0 + _CARRY_ROW, _ONE_ROW].set(1.0)
    # layers 1, 2: bias in column _CARRY_ROW (=31); carry the 1 forward.
    for off, w, b in ((_W1, w1, b1), (_W2, w2, b2)):
        slab = slab.at[off:off + w.shape[0], :w.shape[1]].set(w)
        slab = slab.at[off:off + b.shape[0], _CARRY_ROW].set(b)
        slab = slab.at[off + _CARRY_ROW, _CARRY_ROW].set(1.0)
    # layer 3: bias in column _CARRY_ROW; no carry needed after the last layer.
    slab = slab.at[_W3:_W3 + w3.shape[0], :w3.shape[1]].set(w3)
    slab = slab.at[_W3:_W3 + b3.shape[0], _CARRY_ROW].set(b3)
    return slab


# ---- wrapper ----------------------------------------------------------------
def _choose_tiling(batch, tb_max):
    """(tb, b_pad): tb multiple of 128 (lane-dense stores), sized to the batch to
    minimize tail padding, and >= 2 tiles for large batches (v7x has 2 TCs)."""
    b_lane = _round_up(max(batch, 1), 128)
    if b_lane <= 128:
        return 128, 128
    n_tiles = max(2, -(-b_lane // tb_max))
    tb = _round_up(-(-b_lane // n_tiles), 128)
    return tb, _round_up(b_lane, tb)


@functools.partial(jax.jit, static_argnames=("tb_max",))
def mlp_forward(x, packed, *, tb_max=4096):
    """x: (B, 10) float32, packed: (104, 32) float32 parameter slab -> (B, 2)."""
    B, F = x.shape
    assert F < _IN_PAD, F
    tb, b_pad = _choose_tiling(B, tb_max)

    # Batch on the lane axis: (16, b_pad) with zero padding plus the constant-1
    # bias row. Padded batch columns produce finite garbage that is sliced off.
    x_t = jnp.zeros((_IN_PAD, b_pad), jnp.float32)
    x_t = x_t.at[:F, :B].set(x.T.astype(jnp.float32))
    x_t = x_t.at[_ONE_ROW, :].set(1.0)

    out = pl.pallas_call(
        mlp_kernel,
        out_shape=jax.ShapeDtypeStruct((_OUT_PAD, b_pad), jnp.float32),
        grid=(b_pad // tb,),
        in_specs=[
            pl.BlockSpec((_IN_PAD, tb), lambda i: (0, i)),               # batch-tiled x
            pl.BlockSpec((_PACK_ROWS, _SLAB_LANES), lambda i: (0, 0)),   # resident params
        ],
        out_specs=pl.BlockSpec((_OUT_PAD, tb), lambda i: (0, i)),        # compact output
        compiler_params=pltpu.CompilerParams(
            dimension_semantics=("parallel",),    # shard batch tiles across TCs (v7x)
            vmem_limit_bytes=32 * 1024 * 1024,
        ),
    )(x_t, packed)
    return out[:_NUM_CLASSES, :B].T


# ---- reference & init --------------------------------------------------------
def init_params(key):
    """nn.Linear-style init (uniform +/- 1/sqrt(fan_in)), torch (out, in) layout."""
    dims = [(20, 10), (20, 20), (20, 20), (2, 20)]
    params = []
    for fan_out, fan_in in dims:
        key, kw, kb = jax.random.split(key, 3)
        bound = 1.0 / jnp.sqrt(fan_in)
        w = jax.random.uniform(kw, (fan_out, fan_in), jnp.float32, -bound, bound)
        b = jax.random.uniform(kb, (fan_out,), jnp.float32, -bound, bound)
        params.append((w, b))
    return params


def mlp_reference(x, params):
    h = x
    for i, (w, b) in enumerate(params):
        h = jnp.dot(h, w.T, precision=lax.Precision.HIGHEST) + b
        if i < len(params) - 1:
            h = jnp.maximum(h, 0.0)
    return jax.nn.log_softmax(h, axis=-1)


if __name__ == "__main__":
    key = jax.random.PRNGKey(0)
    key, kx = jax.random.split(key)

    B = 8  # small batch, matching the torch module's 10-feature input
    x = jax.random.normal(kx, (B, 10), dtype=jnp.float32)
    params = init_params(key)
    packed = pack_params(params)

    out = jax.block_until_ready(mlp_forward(x, packed))
    ref = mlp_reference(x, params)
    assert out.shape == (B, 2), out.shape
    assert jnp.allclose(out, ref, atol=1e-5, rtol=1e-5), (out, ref)

    # Also exercise a multi-tile grid (2 tiles -> both TCs on v7x) + ragged tail.
    B2 = 1000
    x2 = jax.random.normal(jax.random.PRNGKey(1), (B2, 10), dtype=jnp.float32)
    out2 = jax.block_until_ready(mlp_forward(x2, packed))
    ref2 = mlp_reference(x2, params)
    assert out2.shape == (B2, 2), out2.shape
    assert jnp.allclose(out2, ref2, atol=1e-5, rtol=1e-5)

    print("KERNEL_OK")
</pallas_src>

<mosaic_0001>
module attributes {stable_mosaic.version = 11 : i64} {
  func.func @mlp_kernel(%arg0: i32, %arg1: memref<16x128xf32, #tpu.memory_space<vmem>>, %arg2: memref<104x32xf32, #tpu.memory_space<vmem>>, %arg3: memref<8x128xf32, #tpu.memory_space<vmem>>) attributes {dimension_semantics = [#tpu.dimension_semantics<parallel>], iteration_bounds = array<i64: 1>, scalar_prefetch = 0 : i64, scratch_operands = 0 : i64, tpu.core_type = #tpu.core_type<tc>, window_params = [{transform_indices = @transform_0, window_bounds = array<i64: 16, 128>}, {pipeline_mode = #tpu.pipeline_mode<synchronous>, transform_indices = @transform_1, window_bounds = array<i64: 104, 32>}, {transform_indices = @transform_2, window_bounds = array<i64: 8, 128>}]} {
    %c0 = arith.constant 0 : index
    %c0_0 = arith.constant 0 : index
    %0 = vector.load %arg1[%c0, %c0_0] : memref<16x128xf32, #tpu.memory_space<vmem>>, vector<16x128xf32>
    %c0_1 = arith.constant 0 : index
    %c0_2 = arith.constant 0 : index
    %1 = vector.load %arg2[%c0_1, %c0_2] : memref<104x32xf32, #tpu.memory_space<vmem>>, vector<32x16xf32>
    %cst = arith.constant dense<0.000000e+00> : vector<32x128xf32>
    %2 = tpu.matmul %1, %0, %cst {dimension_numbers = #tpu.dot_dimension_numbers<[1], [0], [0], [1], [0, 0, 1, 1], [], []>, precision = #tpu.contract_precision<fp32>} : vector<32x16xf32>, vector<16x128xf32>, vector<32x128xf32> -> vector<32x128xf32>
    %cst_3 = arith.constant 0.000000e+00 : f32
    %3 = vector.broadcast %cst_3 : f32 to vector<32x128xf32>
    %4 = arith.maximumf %2, %3 : vector<32x128xf32>
    %c32 = arith.constant 32 : index
    %c0_4 = arith.constant 0 : index
    %5 = vector.load %arg2[%c32, %c0_4] : memref<104x32xf32, #tpu.memory_space<vmem>>, vector<32x32xf32>
    %cst_5 = arith.constant dense<0.000000e+00> : vector<32x128xf32>
    %6 = tpu.matmul %5, %4, %cst_5 {dimension_numbers = #tpu.dot_dimension_numbers<[1], [0], [0], [1], [0, 0, 1, 1], [], []>, precision = #tpu.contract_precision<fp32>} : vector<32x32xf32>, vector<32x128xf32>, vector<32x128xf32> -> vector<32x128xf32>
    %cst_6 = arith.constant 0.000000e+00 : f32
    %7 = vector.broadcast %cst_6 : f32 to vector<32x128xf32>
    %8 = arith.maximumf %6, %7 : vector<32x128xf32>
    %c64 = arith.constant 64 : index
    %c0_7 = arith.constant 0 : index
    %9 = vector.load %arg2[%c64, %c0_7] : memref<104x32xf32, #tpu.memory_space<vmem>>, vector<32x32xf32>
    %cst_8 = arith.constant dense<0.000000e+00> : vector<32x128xf32>
    %10 = tpu.matmul %9, %8, %cst_8 {dimension_numbers = #tpu.dot_dimension_numbers<[1], [0], [0], [1], [0, 0, 1, 1], [], []>, precision = #tpu.contract_precision<fp32>} : vector<32x32xf32>, vector<32x128xf32>, vector<32x128xf32> -> vector<32x128xf32>
    %cst_9 = arith.constant 0.000000e+00 : f32
    %11 = vector.broadcast %cst_9 : f32 to vector<32x128xf32>
    %12 = arith.maximumf %10, %11 : vector<32x128xf32>
    %c96 = arith.constant 96 : index
    %c0_10 = arith.constant 0 : index
    %13 = vector.load %arg2[%c96, %c0_10] : memref<104x32xf32, #tpu.memory_space<vmem>>, vector<8x32xf32>
    %cst_11 = arith.constant dense<0.000000e+00> : vector<8x128xf32>
    %14 = tpu.matmul %13, %12, %cst_11 {dimension_numbers = #tpu.dot_dimension_numbers<[1], [0], [0], [1], [0, 0, 1, 1], [], []>, precision = #tpu.contract_precision<fp32>} : vector<8x32xf32>, vector<32x128xf32>, vector<8x128xf32> -> vector<8x128xf32>
    %15 = tpu.iota {dimensions = array<i32: 0>} : vector<8x128xi32>
    %c2_i32 = arith.constant 2 : i32
    %16 = vector.broadcast %c2_i32 : i32 to vector<8x128xi32>
    %17 = arith.cmpi slt, %15, %16 : vector<8x128xi32>
    %cst_12 = arith.constant -1.000000e+30 : f32
    %18 = vector.broadcast %cst_12 : f32 to vector<8x128xf32>
    %19 = arith.select %17, %14, %18 : vector<8x128xi1>, vector<8x128xf32>
    %cst_13 = arith.constant dense<0xFF800000> : vector<128xf32>
    %20 = vector.multi_reduction <maximumf>, %19, %cst_13 [0] : vector<8x128xf32> to vector<128xf32>
    %21 = vector.shape_cast %20 : vector<128xf32> to vector<1x128xf32>
    %22 = vector.broadcast %21 : vector<1x128xf32> to vector<8x128xf32>
    %23 = arith.subf %19, %22 : vector<8x128xf32>
    %24 = math.exp %23 : vector<8x128xf32>
    %cst_14 = arith.constant dense<0.000000e+00> : vector<128xf32>
    %25 = vector.multi_reduction <add>, %24, %cst_14 [0] : vector<8x128xf32> to vector<128xf32>
    %26 = vector.shape_cast %25 : vector<128xf32> to vector<1x128xf32>
    %27 = math.log %26 : vector<1x128xf32>
    %28 = vector.broadcast %27 : vector<1x128xf32> to vector<8x128xf32>
    %29 = arith.subf %23, %28 : vector<8x128xf32>
    %c0_15 = arith.constant 0 : index
    %c0_16 = arith.constant 0 : index
    %30 = vector.load %arg3[%c0_15, %c0_16] : memref<8x128xf32, #tpu.memory_space<vmem>>, vector<8x128xf32>
    tpu.vector_store %arg3[%c0_15, %c0_16], %29 {strides = array<i32>} : memref<8x128xf32, #tpu.memory_space<vmem>>, vector<8x128xf32>,
    return
  }
  func.func @transform_0(%arg0: i32) -> (i32, i32) {
    %c0_i32 = arith.constant 0 : i32
    %c0_i32_0 = arith.constant 0 : i32
    return %c0_i32, %arg0 : i32, i32
  }
  func.func @transform_1(%arg0: i32) -> (i32, i32) {
    %c0_i32 = arith.constant 0 : i32
    %c0_i32_0 = arith.constant 0 : i32
    %c0_i32_1 = arith.constant 0 : i32
    return %c0_i32, %c0_i32_0 : i32, i32
  }
  func.func @transform_2(%arg0: i32) -> (i32, i32) {
    %c0_i32 = arith.constant 0 : i32
    %c0_i32_0 = arith.constant 0 : i32
    return %c0_i32, %arg0 : i32, i32
  }
}

</mosaic_0001>

<bundles_post_ra>
// kernel: mlp_forward.1
= control target key start
LH: loop header
LB: loop body
LE: loop exit
PB: predicated region body
PF: predicated region fallthrough
CT: control target
= control target key end

     0   :  { %vm17_vm0 = vcmask 130048   ;;  %vm626_vm1 = vcmask 261120   ;;  %vm3097_vm2 = vmmov 0   ;;  %s3335_s0 = inlined_call_operand.vmem [shape: f32[16,128], index: 0, kind: input, shape index: {}]   ;;  %s3336_s1 = inlined_call_operand.vmem [shape: f32[104,32], index: 1, kind: input, shape index: {}]   ;;  %s3337_s2 = inlined_call_operand.vmem [shape: f32[8,128], index: 2, kind: output, shape index: {}]  }
   0x1   :  { %v11_v0 = vld [vmem:[%s3335_s0] sm:$0xff]  ;;  %v12_v1 = vld [vmem:[%s3335_s0 + $0x8] sm:$0xff]  ;;  %v15_v7 = vld [vmem:[%s3336_s1 + $0x10] sm:$0xff] }
   0x2   :  { %v13_v2 = vld [vmem:[%s3336_s1] sm:$0xff]  ;;  %v31_v3 = vand.u32 4294901760, %v11_v0  ;;  %v34_v4 = vand.u32 4294901760, %v12_v1  ;;  %v14_v6 = vld [vmem:[%s3336_s1 + $0x8] sm:$0xff]  ;;  %v16_v8 = vld [vmem:[%s3336_s1 + $0x18] sm:$0xff]  ;;  %v25_v11 = vsel %vm17_vm0, %v15_v7, 0 }
   0x3   :  { %v19_v5 = vsel %vm17_vm0, %v13_v2, 0  ;;  %v22_v10 = vsel %vm17_vm0, %v14_v6, 0  ;;  %v28_v12 = vsel %vm17_vm0, %v16_v8, 0  ;;  %v117_v18 = vand.u32 4294901760, %v25_v11  ;;  %v622_v44 = vld [vmem:[%s3336_s1 + $0x20] sm:$0xff]  ;;  %v623_v51 = vld [vmem:[%s3336_s1 + $0x28] sm:$0xff] }
   0x4   :  { %v3132_v9 = vand.u32 4294901760, %v19_v5  ;;  %v2863_v13 = vpack.c.bf16 %v34_v4, %v31_v3  ;;  %v107_v14 = vand.u32 4294901760, %v22_v10  ;;  %v139_v15 = vsub.f32 %v11_v0, %v31_v3  ;;  %v624_v52 = vld [vmem:[%s3336_s1 + $0x30] sm:$0xff]  ;;  %v625_v55 = vld [vmem:[%s3336_s1 + $0x38] sm:$0xff] }
   0x5   :  { %v146_v16 = vsub.f32 %v12_v1, %v34_v4  ;;  %v127_v19 = vand.u32 4294901760, %v28_v12  ;;  %v118_v24 = vsub.f32 %v25_v11, %v117_v18  ;;  %v628_v45 = vsel %vm626_vm1, %v622_v44, 0  ;;  %v1257_v44 = vld [vmem:[%s3336_s1 + $0x40] sm:$0xff] }
   0x6   :  { %v98_v17 = vsub.f32 %v19_v5, %v3132_v9  ;;  %2864 = vmatprep.subr.bf16.mxu0 %v2863_v13  ;;  %v108_v20 = vsub.f32 %v22_v10, %v107_v14  ;;  %v140_v21 = vand.u32 4294901760, %v139_v15  ;;  %v3142_v46 = vand.u32 4294901760, %v628_v45 }
   0x7   :  { %v147_v22 = vand.u32 4294901760, %v146_v16  ;;  %2866 = vmatpush3.bf16.msra.mxu0 %v2863_v13  ;;  %v128_v25 = vsub.f32 %v28_v12, %v127_v19  ;;  %v119_v30 = vand.u32 4294901760, %v118_v24  ;;  %v2871_v40 = vpack.c.bf16 %v146_v16, %v139_v15 }
   0x8   :  { %v99_v23 = vand.u32 4294901760, %v98_v17  ;;  %v109_v26 = vand.u32 4294901760, %v108_v20  ;;  %v141_v27 = vsub.f32 %v139_v15, %v140_v21  ;;  %v3145_v47 = vsub.f32 %v628_v45, %v3142_v46 }
   0x9   :  { %v148_v28 = vsub.f32 %v146_v16, %v147_v22  ;;  %v129_v31 = vand.u32 4294901760, %v128_v25  ;;  %v120_v36 = vsub.f32 %v118_v24, %v119_v30  ;;  %v2879_v43 = vpack.c.bf16 %v147_v22, %v140_v21 }
   0xa   :  { %v100_v29 = vsub.f32 %v98_v17, %v99_v23  ;;  %v110_v32 = vsub.f32 %v108_v20, %v109_v26  ;;  %v142_v33 = vand.u32 4294901760, %v141_v27  ;;  %v710_v48 = vand.u32 4294901760, %v3145_v47 }
   0xb   :  { %v149_v34 = vand.u32 4294901760, %v148_v28  ;;  %v130_v37 = vsub.f32 %v128_v25, %v129_v31  ;;  %v121_v41 = vand.u32 4294901760, %v120_v36  ;;  %v631_v53 = vsel %vm626_vm1, %v623_v51, 0  ;;  %v1258_v51 = vld [vmem:[%s3336_s1 + $0x48] sm:$0xff] }
   0xc   :  { %v101_v35 = vand.u32 4294901760, %v100_v29  ;;  %v111_v38 = vand.u32 4294901760, %v110_v32  ;;  %v711_v49 = vsub.f32 %v3145_v47, %v710_v48  ;;  %v634_v54 = vsel %vm626_vm1, %v624_v52, 0  ;;  %v1259_v52 = vld [vmem:[%s3336_s1 + $0x50] sm:$0xff] }
   0xd   :  { %v2867_v39 = vpack.c.bf16 %v149_v34, %v142_v33  ;;  %v131_v42 = vand.u32 4294901760, %v130_v37  ;;  %v3162_v56 = vand.u32 4294901760, %v631_v53  ;;  %v3164_v57 = vand.u32 4294901760, %v634_v54 }
   0xe   :  { %2573 = vmatprep.mubr.f32.mxu0 %v101_v35  ;;  %v712_v50 = vand.u32 4294901760, %v711_v49  ;;  %v637_v58 = vsel %vm626_vm1, %v625_v55, 0  ;;  %v1262_v45 = vsel %vm626_vm1, %v1257_v44, 0  ;;  %v1260_v55 = vld [vmem:[%s3336_s1 + $0x58] sm:$0xff]  ;;  %v3096_v44 = vmov 0.0|0.0  }
   0xf   :  { %2574 = vmatmul.mubr.f32.vlgmr.msra.gmra.mrb[0].mxu0 %v111_v38  ;;  %2868 = vmatprep.subr.bf16.mxu0 %v2867_v39  ;;  %v3168_v59 = vsub.f32 %v631_v53, %v3162_v56  ;;  %v3170_v61 = vand.u32 4294901760, %v637_v58  ;;  %v3173_v0 = vsub.f32 %v634_v54, %v3164_v57  ;;  %v1265_v53 = vsel %vm626_vm1, %v1258_v51, 0 }
  0x10   :  { %2870 = vmatpush3.bf16.msra.mxu0 %v2867_v39  ;;  %2576 = vmatprep.mubr.f32.mxu0 %v121_v41  ;;  %v1268_v54 = vsel %vm626_vm1, %v1259_v52, 0 }
  0x11   :  { %2872 = vmatprep.subr.bf16.mxu0 %v2871_v40  ;;  %2637 = vmatprep.mubr.f32.mxu1 %v712_v50  ;;  %v720_v3 = vand.u32 4294901760, %v3168_v59  ;;  %v3177_v6 = vsub.f32 %v637_v58, %v3170_v61  ;;  %v730_v10 = vand.u32 4294901760, %v3173_v0  ;;  %v1271_v58 = vsel %vm626_vm1, %v1260_v55, 0 }
  0x13   :  { %2577 = vmatmul.mubr.f32.gmra.mrb[2].mxu0 %v131_v42  ;;  %v721_v16 = vsub.f32 %v3168_v59, %v720_v3 }
  0x14   :  { %2583 = vmatprep.mubr.f32.mxu0 %v3132_v9 }
  0x15   :  { %v722_v29 = vand.u32 4294901760, %v721_v16 }
  0x17   :  { %2584 = vmatmul.mubr.f32.vlgmr.msra.gmra.mrb[0].mxu0 %v107_v14 }
  0x18   :  { %2874 = vmatpush3.bf16.msra.mxu0 %v2871_v40  ;;  %2586 = vmatprep.mubr.f32.mxu0 %v117_v18 }
  0x19   :  { %2876 = vmatprep.subr.bf16.mxu0 %v2863_v13 }
  0x1b   :  { %2587 = vmatmul.mubr.f32.gmra.mrb[2].mxu0 %v127_v19 }
  0x1c   :  { %2593 = vmatprep.mubr.f32.mxu0 %v98_v17 }
  0x1f   :  { %2594 = vmatmul.mubr.f32.vlgmr.msra.gmra.mrb[0].mxu0 %v108_v20 }
  0x20   :  { %2878 = vmatpush3.bf16.msra.mxu0 %v2863_v13  ;;  %2596 = vmatprep.mubr.f32.mxu0 %v118_v24 }
  0x21   :  { %2880 = vmatprep.subr.bf16.mxu0 %v2879_v43 }
  0x23   :  { %2597 = vmatmul.mubr.f32.gmra.mrb[2].mxu0 %v128_v25 }
  0x24   :  { %2603 = vmatprep.mubr.f32.mxu0 %v99_v23  ;;  %v731_v23 = vsub.f32 %v3173_v0, %v730_v10 }
  0x26   :  { %v732_v35 = vand.u32 4294901760, %v731_v23 }
  0x27   :  { %2604 = vmatmul.mubr.f32.vlgmr.msra.gmra.mrb[0].mxu0 %v109_v26 }
  0x28   :  { %2882 = vmatpush3.bf16.msra.mxu0 %v2879_v43  ;;  %2606 = vmatprep.mubr.f32.mxu0 %v119_v30 }
  0x29   :  { %2884 = vmatprep.subr.bf16.mxu0 %v2863_v13 }
  0x2b   :  { %2607 = vmatmul.mubr.f32.gmra.mrb[2].mxu0 %v129_v31 }
  0x2c   :  { %2613 = vmatprep.mubr.f32.mxu0 %v3132_v9 }
  0x2f   :  { %2614 = vmatmul.mubr.f32.vlgmr.msra.gmra.mrb[0].mxu0 %v107_v14 }
  0x30   :  { %2886 = vmatpush3.bf16.msra.mxu0 %v2863_v13  ;;  %2616 = vmatprep.mubr.f32.mxu0 %v117_v18 }
  0x33   :  { %2617 = vmatmul.mubr.f32.gmra.mrb[2].mxu0 %v127_v19 }
  0x34   :  { %2623 = vmatprep.mubr.f32.mxu0 %v3132_v9 }
  0x37   :  { %2624 = vmatmul.mubr.f32.vlgmr.msra.gmra.mrb[0].mxu0 %v107_v14 }
  0x38   :  { %2626 = vmatprep.mubr.f32.mxu0 %v117_v18 }
  0x3b   :  { %2627 = vmatmul.mubr.f32.gmra.mrb[2].mxu0 %v127_v19  ;;  %v740_v19 = vand.u32 4294901760, %v3177_v6 }
  0x3d   :  { %v741_v33 = vsub.f32 %v3177_v6, %v740_v19 }
  0x3f   :  { %v742_v41 = vand.u32 4294901760, %v741_v33 }
 0x10a   :  { %v2625_v60 = vpop.f32.mrb[0].mxu0 }
 0x10b   :  { %v619_v62 = vmax.f32 %v2625_v60, 0.0  ;;  %v596_v63 = vpop.f32.mrb[1].mxu0 }
 0x10c   :  { %v618_v1 = vmax.f32 %v596_v63, 0.0 }
 0x10d   :  { %v643_v2 = vand.u32 4294901760, %v619_v62 }
 0x10e   :  { %v640_v4 = vand.u32 4294901760, %v618_v1  ;;  %v2628_v5 = vpop.f32.mrb[2].mxu0 }
 0x10f   :  { %v757_v7 = vsub.f32 %v619_v62, %v643_v2  ;;  %v621_v8 = vmax.f32 %v2628_v5, 0.0  ;;  %v608_v9 = vpop.f32.mrb[3].mxu0 }
 0x110   :  { %v3180_v11 = vpack.c.bf16 %v643_v2, %v640_v4  ;;  %v750_v12 = vsub.f32 %v618_v1, %v640_v4  ;;  %v620_v13 = vmax.f32 %v608_v9, 0.0 }
 0x111   :  { %v758_v14 = vand.u32 4294901760, %v757_v7  ;;  %v649_v15 = vand.u32 4294901760, %v621_v8 }
 0x112   :  { %v751_v17 = vand.u32 4294901760, %v750_v12  ;;  %v646_v18 = vand.u32 4294901760, %v620_v13  ;;  %2888 = vmatprep.subr.bf16.mxu1 %v3180_v11  ;;  %v2903_v20 = vpack.c.bf16 %v757_v7, %v750_v12 }
 0x113   :  { %v771_v21 = vsub.f32 %v621_v8, %v649_v15  ;;  %2890 = vmatpush3.bf16.msra.mxu1 %v3180_v11  ;;  %v759_v22 = vsub.f32 %v757_v7, %v758_v14 }
 0x114   :  { %v2891_v24 = vpack.c.bf16 %v649_v15, %v646_v18  ;;  %v764_v25 = vsub.f32 %v620_v13, %v646_v18  ;;  %v752_v26 = vsub.f32 %v750_v12, %v751_v17  ;;  %v2919_v27 = vpack.c.bf16 %v758_v14, %v751_v17 }
 0x115   :  { %v772_v28 = vand.u32 4294901760, %v771_v21  ;;  %v760_v30 = vand.u32 4294901760, %v759_v22 }
 0x116   :  { %v765_v31 = vand.u32 4294901760, %v764_v25  ;;  %2892 = vmatprep.subr.bf16.mxu1 %v2891_v24  ;;  %v753_v32 = vand.u32 4294901760, %v752_v26  ;;  %v2907_v34 = vpack.c.bf16 %v771_v21, %v764_v25 }
 0x117   :  { %2894 = vmatpush3.bf16.msra.mxu1 %v2891_v24  ;;  %v773_v36 = vsub.f32 %v771_v21, %v772_v28 }
 0x118   :  { %v2895_v37 = vpack.c.bf16 %v760_v30, %v753_v32  ;;  %v766_v38 = vsub.f32 %v764_v25, %v765_v31  ;;  %v2923_v39 = vpack.c.bf16 %v772_v28, %v765_v31 }
 0x119   :  { %v774_v40 = vand.u32 4294901760, %v773_v36 }
 0x11a   :  { %2638 = vmatmul.mubr.f32.vlgmr.msra.gmra.mrb[0].mxu1 %v722_v29  ;;  %2896 = vmatprep.subr.bf16.mxu1 %v2895_v37  ;;  %v767_v42 = vand.u32 4294901760, %v766_v38 }
 0x11b   :  { %2898 = vmatpush3.bf16.msra.mxu1 %v2895_v37  ;;  %2640 = vmatprep.mubr.f32.mxu1 %v732_v35 }
 0x11c   :  { %v2899_v43 = vpack.c.bf16 %v774_v40, %v767_v42 }
 0x11e   :  { %2641 = vmatmul.mubr.f32.gmra.mrb[2].mxu1 %v742_v41  ;;  %2900 = vmatprep.subr.bf16.mxu1 %v2899_v43 }
 0x11f   :  { %2902 = vmatpush3.bf16.msra.mxu1 %v2899_v43  ;;  %2651 = vmatprep.mubr.f32.mxu1 %v3142_v46 }
 0x120   :  { %2904 = vmatprep.subr.bf16.mxu1 %v2903_v20 }
 0x122   :  { %2652 = vmatmul.mubr.f32.vlgmr.msra.gmra.mrb[0].mxu1 %v3162_v56 }
 0x123   :  { %2906 = vmatpush3.bf16.msra.mxu1 %v2903_v20  ;;  %2654 = vmatprep.mubr.f32.mxu1 %v3164_v57 }
 0x124   :  { %2908 = vmatprep.subr.bf16.mxu1 %v2907_v34 }
 0x126   :  { %2655 = vmatmul.mubr.f32.gmra.mrb[2].mxu1 %v3170_v61 }
 0x127   :  { %2910 = vmatpush3.bf16.msra.mxu1 %v2907_v34  ;;  %2665 = vmatprep.mubr.f32.mxu1 %v3145_v47  ;;  %v3222_v47 = vand.u32 4294901760, %v1262_v45 }
 0x128   :  { %2912 = vmatprep.subr.bf16.mxu1 %v3180_v11 }
 0x12a   :  { %2666 = vmatmul.mubr.f32.vlgmr.msra.gmra.mrb[0].mxu1 %v3168_v59 }
 0x12b   :  { %2914 = vmatpush3.bf16.msra.mxu1 %v3180_v11  ;;  %2668 = vmatprep.mubr.f32.mxu1 %v3173_v0 }
 0x12c   :  { %2916 = vmatprep.subr.bf16.mxu1 %v2891_v24 }
 0x12e   :  { %2669 = vmatmul.mubr.f32.gmra.mrb[2].mxu1 %v3177_v6 }
 0x12f   :  { %2918 = vmatpush3.bf16.msra.mxu1 %v2891_v24  ;;  %2679 = vmatprep.mubr.f32.mxu1 %v710_v48  ;;  %v3225_v48 = vsub.f32 %v1262_v45, %v3222_v47  ;;  %v3098_v45 = vmov 0.0  }
 0x130   :  { %2920 = vmatprep.subr.bf16.mxu1 %v2919_v27 }
 0x131   :  { %v1344_v49 = vand.u32 4294901760, %v3225_v48 }
 0x132   :  { %2680 = vmatmul.mubr.f32.vlgmr.msra.gmra.mrb[0].mxu1 %v720_v3 }
 0x133   :  { %2922 = vmatpush3.bf16.msra.mxu1 %v2919_v27  ;;  %2682 = vmatprep.mubr.f32.mxu1 %v730_v10 }
 0x134   :  { %2924 = vmatprep.subr.bf16.mxu1 %v2923_v39 }
 0x136   :  { %2683 = vmatmul.mubr.f32.gmra.mrb[2].mxu1 %v740_v19 }
 0x137   :  { %2926 = vmatpush3.bf16.msra.mxu1 %v2923_v39  ;;  %2693 = vmatprep.mubr.f32.mxu1 %v3142_v46 }
 0x138   :  { %2928 = vmatprep.subr.bf16.mxu1 %v3180_v11 }
 0x13a   :  { %2694 = vmatmul.mubr.f32.vlgmr.msra.gmra.mrb[0].mxu1 %v3162_v56 }
 0x13b   :  { %2930 = vmatpush3.bf16.msra.mxu1 %v3180_v11  ;;  %2696 = vmatprep.mubr.f32.mxu1 %v3164_v57 }
 0x13c   :  { %2932 = vmatprep.subr.bf16.mxu1 %v2891_v24 }
 0x13e   :  { %2697 = vmatmul.mubr.f32.gmra.mrb[2].mxu1 %v3170_v61 }
 0x13f   :  { %2934 = vmatpush3.bf16.msra.mxu1 %v2891_v24  ;;  %2707 = vmatprep.mubr.f32.mxu1 %v3142_v46  ;;  %v1345_v46 = vsub.f32 %v3225_v48, %v1344_v49 }
 0x140   :  { %2983 = vmatprep.subr.bf16.mxu1 %v3096_v44 }
 0x141   :  { %v1346_v50 = vand.u32 4294901760, %v1345_v46 }
 0x142   :  { %2708 = vmatmul.mubr.f32.vlgmr.msra.gmra.mrb[0].mxu1 %v3162_v56  ;;  %v3242_v56 = vand.u32 4294901760, %v1265_v53 }
 0x143   :  { %2710 = vmatprep.mubr.f32.mxu1 %v3164_v57  ;;  %2721 = vmatprep.mubr.f32.mxu0 %v1346_v50  ;;  %v3244_v57 = vand.u32 4294901760, %v1268_v54 }
 0x144   :  { %v3248_v59 = vsub.f32 %v1265_v53, %v3242_v56 }
 0x145   :  { %v3253_v0 = vsub.f32 %v1268_v54, %v3244_v57 }
 0x146   :  { %2711 = vmatmul.mubr.f32.gmra.mrb[2].mxu1 %v3170_v61  ;;  %v3250_v61 = vand.u32 4294901760, %v1271_v58  ;;  %v1354_v3 = vand.u32 4294901760, %v3248_v59 }
 0x147   :  { %v1364_v10 = vand.u32 4294901760, %v3253_v0  ;;  %2805 = vmatprep.mubr.msk.f32.mxu1 %vm3097_vm2, %v3098_v45 }
 0x148   :  { %v3257_v6 = vsub.f32 %v1271_v58, %v3250_v61  ;;  %v1355_v16 = vsub.f32 %v3248_v59, %v1354_v3 }
 0x149   :  { %v1365_v23 = vsub.f32 %v3253_v0, %v1364_v10 }
 0x14a   :  { %v1374_v19 = vand.u32 4294901760, %v3257_v6  ;;  %v1356_v29 = vand.u32 4294901760, %v1355_v16 }
 0x14b   :  { %v1366_v35 = vand.u32 4294901760, %v1365_v23 }
 0x14c   :  { %v1375_v33 = vsub.f32 %v3257_v6, %v1374_v19 }
 0x14e   :  { %v1376_v41 = vand.u32 4294901760, %v1375_v33 }
 0x215   :  { %v2709_v60 = vpop.f32.mrb[0].mxu1 }
 0x216   :  { %v1254_v62 = vmax.f32 %v2709_v60, 0.0  ;;  %v1231_v63 = vpop.f32.mrb[1].mxu1 }
 0x217   :  { %v1253_v1 = vmax.f32 %v1231_v63, 0.0 }
 0x218   :  { %v1277_v2 = vand.u32 4294901760, %v1254_v62 }
 0x219   :  { %v1274_v4 = vand.u32 4294901760, %v1253_v1  ;;  %v2712_v5 = vpop.f32.mrb[2].mxu1 }
 0x21a   :  { %v1391_v7 = vsub.f32 %v1254_v62, %v1277_v2  ;;  %v1256_v8 = vmax.f32 %v2712_v5, 0.0  ;;  %v1243_v9 = vpop.f32.mrb[3].mxu1 }
 0x21b   :  { %v3260_v11 = vpack.c.bf16 %v1277_v2, %v1274_v4  ;;  %v1384_v12 = vsub.f32 %v1253_v1, %v1274_v4  ;;  %v1255_v13 = vmax.f32 %v1243_v9, 0.0 }
 0x21c   :  { %v1392_v14 = vand.u32 4294901760, %v1391_v7  ;;  %v1283_v15 = vand.u32 4294901760, %v1256_v8 }
 0x21d   :  { %v1385_v17 = vand.u32 4294901760, %v1384_v12  ;;  %v1280_v18 = vand.u32 4294901760, %v1255_v13  ;;  %2936 = vmatprep.subr.bf16.mxu0 %v3260_v11  ;;  %v2951_v20 = vpack.c.bf16 %v1391_v7, %v1384_v12 }
 0x21e   :  { %v1405_v21 = vsub.f32 %v1256_v8, %v1283_v15  ;;  %2938 = vmatpush3.bf16.msra.mxu0 %v3260_v11  ;;  %v1393_v22 = vsub.f32 %v1391_v7, %v1392_v14 }
 0x21f   :  { %v2939_v24 = vpack.c.bf16 %v1283_v15, %v1280_v18  ;;  %v1398_v25 = vsub.f32 %v1255_v13, %v1280_v18  ;;  %v1386_v26 = vsub.f32 %v1384_v12, %v1385_v17  ;;  %v2967_v27 = vpack.c.bf16 %v1392_v14, %v1385_v17 }
 0x220   :  { %v1406_v28 = vand.u32 4294901760, %v1405_v21  ;;  %v1394_v30 = vand.u32 4294901760, %v1393_v22 }
 0x221   :  { %v1399_v31 = vand.u32 4294901760, %v1398_v25  ;;  %2940 = vmatprep.subr.bf16.mxu0 %v2939_v24  ;;  %v1387_v32 = vand.u32 4294901760, %v1386_v26  ;;  %v2955_v34 = vpack.c.bf16 %v1405_v21, %v1398_v25 }
 0x222   :  { %2942 = vmatpush3.bf16.msra.mxu0 %v2939_v24  ;;  %v1407_v36 = vsub.f32 %v1405_v21, %v1406_v28 }
 0x223   :  { %v2943_v37 = vpack.c.bf16 %v1394_v30, %v1387_v32  ;;  %v1400_v38 = vsub.f32 %v1398_v25, %v1399_v31  ;;  %v2971_v39 = vpack.c.bf16 %v1406_v28, %v1399_v31  ;;  %v2380_v25 = vlaneseq }
 0x224   :  { %v1408_v40 = vand.u32 4294901760, %v1407_v36 }
 0x225   :  { %2722 = vmatmul.mubr.f32.vlgmr.msra.gmra.mrb[4].mxu0 %v1356_v29  ;;  %2944 = vmatprep.subr.bf16.mxu0 %v2943_v37  ;;  %v1401_v42 = vand.u32 4294901760, %v1400_v38  ;;  %v2381_v26 = vshrl.u32 %v2380_v25, 7 }
 0x226   :  { %2946 = vmatpush3.bf16.msra.mxu0 %v2943_v37  ;;  %2724 = vmatprep.mubr.f32.mxu0 %v1366_v35 }
 0x227   :  { %v2947_v43 = vpack.c.bf16 %v1408_v40, %v1401_v42  ;;  %vm2382_vm3 = vcmp.lt.s32.totalorder %v2381_v26, 2 }
 0x229   :  { %2725 = vmatmul.mubr.f32.gmra.mrb[6].mxu0 %v1376_v41  ;;  %2948 = vmatprep.subr.bf16.mxu0 %v2947_v43 }
 0x22a   :  { %2950 = vmatpush3.bf16.msra.mxu0 %v2947_v43  ;;  %2735 = vmatprep.mubr.f32.mxu0 %v3222_v47 }
 0x22b   :  { %2952 = vmatprep.subr.bf16.mxu0 %v2951_v20 }
 0x22d   :  { %2736 = vmatmul.mubr.f32.vlgmr.msra.gmra.mrb[4].mxu0 %v3242_v56 }
 0x22e   :  { %2954 = vmatpush3.bf16.msra.mxu0 %v2951_v20  ;;  %2738 = vmatprep.mubr.f32.mxu0 %v3244_v57 }
 0x22f   :  { %2956 = vmatprep.subr.bf16.mxu0 %v2955_v34 }
 0x231   :  { %2739 = vmatmul.mubr.f32.gmra.mrb[6].mxu0 %v3250_v61 }
 0x232   :  { %2958 = vmatpush3.bf16.msra.mxu0 %v2955_v34  ;;  %2749 = vmatprep.mubr.f32.mxu0 %v3225_v48  ;;  %v1891_v48 = vld [vmem:[%s3336_s1 + $0x60] sm:$0xff] }
 0x233   :  { %2960 = vmatprep.subr.bf16.mxu0 %v3260_v11 }
 0x235   :  { %2750 = vmatmul.mubr.f32.vlgmr.msra.gmra.mrb[4].mxu0 %v3248_v59 }
 0x236   :  { %2962 = vmatpush3.bf16.msra.mxu0 %v3260_v11  ;;  %2752 = vmatprep.mubr.f32.mxu0 %v3253_v0 }
 0x237   :  { %2964 = vmatprep.subr.bf16.mxu0 %v2939_v24 }
 0x239   :  { %2753 = vmatmul.mubr.f32.gmra.mrb[6].mxu0 %v3257_v6 }
 0x23a   :  { %2966 = vmatpush3.bf16.msra.mxu0 %v2939_v24  ;;  %2763 = vmatprep.mubr.f32.mxu0 %v1344_v49 }
 0x23b   :  { %2968 = vmatprep.subr.bf16.mxu0 %v2967_v27 }
 0x23d   :  { %2764 = vmatmul.mubr.f32.vlgmr.msra.gmra.mrb[4].mxu0 %v1354_v3 }
 0x23e   :  { %2970 = vmatpush3.bf16.msra.mxu0 %v2967_v27  ;;  %2766 = vmatprep.mubr.f32.mxu0 %v1364_v10 }
 0x23f   :  { %2972 = vmatprep.subr.bf16.mxu0 %v2971_v39 }
 0x241   :  { %2767 = vmatmul.mubr.f32.gmra.mrb[6].mxu0 %v1374_v19 }
 0x242   :  { %2974 = vmatpush3.bf16.msra.mxu0 %v2971_v39  ;;  %2777 = vmatprep.mubr.f32.mxu0 %v3222_v47 }
 0x243   :  { %2976 = vmatprep.subr.bf16.mxu0 %v3260_v11 }
 0x245   :  { %2778 = vmatmul.mubr.f32.vlgmr.msra.gmra.mrb[4].mxu0 %v3242_v56 }
 0x246   :  { %2978 = vmatpush3.bf16.msra.mxu0 %v3260_v11  ;;  %2780 = vmatprep.mubr.f32.mxu0 %v3244_v57 }
 0x247   :  { %2980 = vmatprep.subr.bf16.mxu0 %v2939_v24 }
 0x249   :  { %2781 = vmatmul.mubr.f32.gmra.mrb[6].mxu0 %v3250_v61 }
 0x24a   :  { %2982 = vmatpush3.bf16.msra.mxu0 %v2939_v24  ;;  %2791 = vmatprep.mubr.f32.mxu0 %v3222_v47  ;;  %v1893_v47 = vsel %vm626_vm1, %v1891_v48, 0 }
 0x24b   :  { %v3305_v49 = vand.u32 4294901760, %v1893_v47 }
 0x24d   :  { %2792 = vmatmul.mubr.f32.vlgmr.msra.gmra.mrb[4].mxu0 %v3242_v56  ;;  %v1965_v46 = vsub.f32 %v1893_v47, %v3305_v49 }
 0x24e   :  { %2794 = vmatprep.mubr.f32.mxu0 %v3244_v57 }
 0x24f   :  { %v1966_v55 = vand.u32 4294901760, %v1965_v46 }
 0x251   :  { %2795 = vmatmul.mubr.f32.gmra.mrb[6].mxu0 %v3250_v61  ;;  %v1967_v2 = vsub.f32 %v1965_v46, %v1966_v55 }
 0x253   :  { %v1968_v14 = vand.u32 4294901760, %v1967_v2 }
 0x320   :  { %v2793_v50 = vpop.f32.mrb[4].mxu0 }
 0x321   :  { %v1888_v51 = vmax.f32 %v2793_v50, 0.0  ;;  %v1865_v52 = vpop.f32.mrb[5].mxu0 }
 0x322   :  { %v1887_v53 = vmax.f32 %v1865_v52, 0.0 }
 0x323   :  { %v1899_v54 = vand.u32 4294901760, %v1888_v51 }
 0x324   :  { %v1896_v56 = vand.u32 4294901760, %v1887_v53  ;;  %v2796_v57 = vpop.f32.mrb[6].mxu0 }
 0x325   :  { %v1983_v58 = vsub.f32 %v1888_v51, %v1899_v54  ;;  %v1890_v59 = vmax.f32 %v2796_v57, 0.0  ;;  %v1877_v60 = vpop.f32.mrb[7].mxu0 }
 0x326   :  { %v2984_v61 = vpack.c.bf16 %v1899_v54, %v1896_v56  ;;  %v1976_v62 = vsub.f32 %v1887_v53, %v1896_v56  ;;  %v1889_v63 = vmax.f32 %v1877_v60, 0.0 }
 0x327   :  { %v1984_v0 = vand.u32 4294901760, %v1983_v58  ;;  %v1905_v1 = vand.u32 4294901760, %v1890_v59 }
 0x328   :  { %v1977_v3 = vand.u32 4294901760, %v1976_v62  ;;  %v2996_v4 = vpack.c.bf16 %v1983_v58, %v1976_v62  ;;  %v1902_v5 = vand.u32 4294901760, %v1889_v63  ;;  %2985 = vmatpush3.bf16.msra.mxu1 %v2984_v61 }
 0x329   :  { %v1985_v6 = vsub.f32 %v1983_v58, %v1984_v0  ;;  %v1997_v7 = vsub.f32 %v1890_v59, %v1905_v1  ;;  %2986 = vmatprep.subr.bf16.mxu1 %v3096_v44 }
 0x32a   :  { %v1978_v8 = vsub.f32 %v1976_v62, %v1977_v3  ;;  %v2987_v9 = vpack.c.bf16 %v1905_v1, %v1902_v5  ;;  %v1990_v10 = vsub.f32 %v1889_v63, %v1902_v5  ;;  %v3008_v11 = vpack.c.bf16 %v1984_v0, %v1977_v3 }
 0x32b   :  { %v1986_v12 = vand.u32 4294901760, %v1985_v6  ;;  %v1998_v13 = vand.u32 4294901760, %v1997_v7 }
 0x32c   :  { %v1979_v15 = vand.u32 4294901760, %v1978_v8  ;;  %v1991_v16 = vand.u32 4294901760, %v1990_v10  ;;  %v2999_v17 = vpack.c.bf16 %v1997_v7, %v1990_v10  ;;  %2988 = vmatpush3.bf16.msra.mxu1 %v2987_v9 }
 0x32d   :  { %v1999_v18 = vsub.f32 %v1997_v7, %v1998_v13  ;;  %2989 = vmatprep.subr.bf16.mxu1 %v3096_v44 }
 0x32e   :  { %v1992_v19 = vsub.f32 %v1990_v10, %v1991_v16  ;;  %v2990_v20 = vpack.c.bf16 %v1986_v12, %v1979_v15  ;;  %v3011_v21 = vpack.c.bf16 %v1998_v13, %v1991_v16 }
 0x32f   :  { %v2000_v22 = vand.u32 4294901760, %v1999_v18  ;;  %2806 = vmatmul.mubr.f32.vlgmr.msra.gmra.mrb[4].mxu1 %v1968_v14 }
 0x330   :  { %v1993_v23 = vand.u32 4294901760, %v1992_v19  ;;  %2991 = vmatpush3.bf16.msra.mxu1 %v2990_v20  ;;  %2816 = vmatprep.mubr.msk.f32.mxu1 %vm3097_vm2, %v3098_v45 }
 0x331   :  { %2992 = vmatprep.subr.bf16.mxu1 %v3096_v44 }
 0x332   :  { %v2993_v24 = vpack.c.bf16 %v2000_v22, %v1993_v23 }
 0x334   :  { %2994 = vmatpush3.bf16.msra.mxu1 %v2993_v24 }
 0x335   :  { %2995 = vmatprep.subr.bf16.mxu1 %v3096_v44 }
 0x337   :  { %2817 = vmatmul.mubr.f32.vlgmr.msra.gmra.mrb[4].mxu1 %v3305_v49 }
 0x338   :  { %2997 = vmatpush3.bf16.msra.mxu1 %v2996_v4  ;;  %2827 = vmatprep.mubr.msk.f32.mxu1 %vm3097_vm2, %v3098_v45 }
 0x339   :  { %2998 = vmatprep.subr.bf16.mxu1 %v3096_v44 }
 0x33c   :  { %3000 = vmatpush3.bf16.msra.mxu1 %v2999_v17 }
 0x33d   :  { %3001 = vmatprep.subr.bf16.mxu1 %v3096_v44 }
 0x33f   :  { %2828 = vmatmul.mubr.f32.vlgmr.msra.gmra.mrb[4].mxu1 %v1965_v46 }
 0x340   :  { %3003 = vmatpush3.bf16.msra.mxu1 %v2984_v61  ;;  %2838 = vmatprep.mubr.msk.f32.mxu1 %vm3097_vm2, %v3098_v45 }
 0x341   :  { %3004 = vmatprep.subr.bf16.mxu1 %v3096_v44 }
 0x344   :  { %3006 = vmatpush3.bf16.msra.mxu1 %v2987_v9 }
 0x345   :  { %3007 = vmatprep.subr.bf16.mxu1 %v3096_v44 }
 0x347   :  { %2839 = vmatmul.mubr.f32.vlgmr.msra.gmra.mrb[4].mxu1 %v1966_v55 }
 0x348   :  { %3009 = vmatpush3.bf16.msra.mxu1 %v3008_v11  ;;  %2849 = vmatprep.mubr.msk.f32.mxu1 %vm3097_vm2, %v3098_v45 }
 0x349   :  { %3010 = vmatprep.subr.bf16.mxu1 %v3096_v44 }
 0x34c   :  { %3012 = vmatpush3.bf16.msra.mxu1 %v3011_v21 }
 0x34d   :  { %3013 = vmatprep.subr.bf16.mxu1 %v3096_v44 }
 0x34f   :  { %2850 = vmatmul.mubr.f32.vlgmr.msra.gmra.mrb[4].mxu1 %v3305_v49 }
 0x350   :  { %3015 = vmatpush3.bf16.msra.mxu1 %v2984_v61  ;;  %2860 = vmatprep.mubr.msk.f32.mxu1 %vm3097_vm2, %v3098_v45 }
 0x351   :  { %3016 = vmatprep.subr.bf16.mxu1 %v3096_v44 }
 0x354   :  { %3018 = vmatpush3.bf16.msra.mxu1 %v2987_v9 }
 0x357   :  { %2861 = vmatmul.mubr.f32.vlgmr.msra.gmra.mrb[4].mxu1 %v3305_v49 }
 0x42a   :  { %v2376_v27 = vpop.f32.mrb[4].mxu1 }
 0x42b   :  { %v2383_v28 = vsel %vm2382_vm3, %v2376_v27, -1e+30  ;;  %v2862_v29 = vpop.f32.mrb[5].mxu1 }
 0x42c   :  { %v2384_v30 = vrot.slane %v2383_v28, 4 }
 0x42e   :  { %v2385_v31 = vmax.f32 %v2383_v28, %v2384_v30 }
 0x430   :  { %v2386_v32 = vrot.slane %v2385_v31, 2 }
 0x432   :  { %v2387_v33 = vmax.f32 %v2385_v31, %v2386_v32 }
 0x434   :  { %v2388_v34 = vrot.slane %v2387_v33, 1 }
 0x436   :  { %v2389_v35 = vmax.f32 %v2387_v33, %v2388_v34 }
 0x438   :  { %v2390_v36 = vsub.f32 %v2383_v28, %v2389_v35 }
 0x43a   :  { %v2391_v37 = vmul.f32 1.442695, %v2390_v36 }
 0x43c   :  { %3092 = vpow2.f32 %v2391_v37 }
 0x446   :  { %v3093_v38 = vpop.eup %3092 }
 0x447   :  { %v2393_v39 = vrot.slane %v3093_v38, 4 }
 0x449   :  { %v2394_v40 = vadd.f32 %v3093_v38, %v2393_v39 }
 0x44b   :  { %v2395_v41 = vrot.slane %v2394_v40, 2 }
 0x44d   :  { %v2396_v42 = vadd.f32 %v2395_v41, %v2394_v40 }
 0x44f   :  { %v2397_v43 = vrot.slane %v2396_v42, 1 }
 0x451   :  { %v2398_v44 = vadd.f32 %v2397_v43, %v2396_v42 }
 0x453   :  { %3094 = vlog2.f32 %v2398_v44 }
 0x45d   :  { %v3095_v45 = vpop.eup %3094 }
 0x45e   :  { %v2400_v48 = vmul.f32 0.6931472, %v3095_v45 }
 0x460   :  { %v2401_v47 = vsub.f32 %v2390_v36, %v2400_v48 }
 0x462   :  { %2402 = vst [vmem:[%s3337_s2] sm:$0xff] %v2401_v47 }

</bundles_post_ra>
